<compile_context>
chip_gen: v5e
topology: v5e:2x2
jax: 0.10.0
libtpu: 0.0.40
codegen_flags: <defaults>
</compile_context>

<pallas_src>
import functools

import jax
import jax.numpy as jnp
from jax.experimental import pallas as pl
from jax.experimental.pallas import tpu as pltpu


_TILE_B = 4096       # batch rows per grid step (multiple of 128)
_VOCAB_PAD = 128     # padded vocab height of the fused table (one lane tile)


def _round_up(x, m):
    return ((x + m - 1) // m) * m


# ----------------------------- Pallas kernel --------------------------------
def _fm_kernel(idx_ref, w_ref, out_ref, *, embed_dim):
    """idx_ref: (FP, TB) int32 -- FP field slots, batch on lanes (lane-dense)
       w_ref  : (128, 128) f32 -- fused table; rows = features, cols = vocab (resident)
       out_ref: (1, TB)    f32 -- sigmoid(logit) per batch lane (lane-dense)
    """
    num_slots, tb = idx_ref.shape
    vocab = w_ref.shape[1]
    idx = idx_ref[...]                                                 # (FP, TB)

    # Multi-hot (vocab, TB): mh[v, b] = #{field slots f : idx[f, b] == v}.
    vocab_iota = jax.lax.broadcasted_iota(jnp.int32, (vocab, tb), 0)
    mh = jnp.zeros((vocab, tb), jnp.float32)
    for f in range(num_slots):                                         # static unroll (8)
        mh = mh + (vocab_iota == idx[f:f + 1, :]).astype(jnp.float32)

    # One MXU matmul realizes the gather + every field sum:
    #   rows 0..D-1 : S_d = sum_f emb[idx_f, d]
    #   row  D      : aux = sum_f w_fm + sum_f2 w_ll + biases - 0.5 * sum_{f,d} emb^2
    r = jnp.dot(w_ref[...], mh, preferred_element_type=jnp.float32)    # (128, TB)

    s = r[0:embed_dim, :]                                              # (D, TB)
    aux = r[embed_dim:embed_dim + 1, :]                                # (1, TB)
    second = 0.5 * jnp.sum(s * s, axis=0, keepdims=True)               # (1, TB) sublane reduce
    out_ref[...] = jax.nn.sigmoid(second + aux)                        # (1, TB)


def _fm_pallas(idx_t, w_t, *, embed_dim, tile_b):
    num_slots, b_pad = idx_t.shape
    num_tiles = b_pad // tile_b
    kernel = functools.partial(_fm_kernel, embed_dim=embed_dim)
    return pl.pallas_call(
        kernel,
        out_shape=jax.ShapeDtypeStruct((1, b_pad), jnp.float32),
        grid=(num_tiles,),
        in_specs=[
            # index stream: (8, TB) int32, batch on lanes -> contiguous, lane-dense DMA
            pl.BlockSpec((num_slots, tile_b), lambda i: (0, i)),
            # fused table: constant block index -> fetched once, stays VMEM-resident
            pl.BlockSpec((_VOCAB_PAD, _VOCAB_PAD), lambda i: (0, 0)),
        ],
        out_specs=pl.BlockSpec((1, tile_b), lambda i: (0, i)),
        compiler_params=pltpu.CompilerParams(
            dimension_semantics=("parallel",),          # shards batch tiles across TCs on v7x
            vmem_limit_bytes=32 * 1024 * 1024),
    )(idx_t, w_t)


# ---------------------------- parameter setup --------------------------------
def init_params(key, fm_field_dims, embed_dim, linear_field_dims):
    k1, k2, k3 = jax.random.split(key, 3)
    fm_vocab = int(sum(fm_field_dims))
    ll_vocab = int(sum(linear_field_dims))
    return {
        "embed_w": 0.1 * jax.random.normal(k1, (fm_vocab, embed_dim), jnp.float32),
        "fm_lin_w": 0.1 * jax.random.normal(k2, (fm_vocab, 1), jnp.float32),
        "fm_lin_b": jnp.asarray([0.05], jnp.float32),
        "ll_lin_w": 0.1 * jax.random.normal(k3, (ll_vocab, 1), jnp.float32),
        "ll_lin_b": jnp.asarray([-0.02], jnp.float32),
        "fm_offsets": jnp.asarray(
            [0] + list(jnp.cumsum(jnp.asarray(fm_field_dims))[:-1]), jnp.int32),
        "ll_offsets": jnp.asarray(
            [0] + list(jnp.cumsum(jnp.asarray(linear_field_dims))[:-1]), jnp.int32),
    }


def _build_fused_table(params, embed_dim):
    """Fold embeddings, both FMLinear weight vectors, both biases and the per-row
    -0.5*sum_d(emb^2) correction into one (128 feat, 128 vocab) f32 table."""
    v_fm = params["embed_w"].shape[0]
    v_ll = params["ll_lin_w"].shape[0]
    emb = params["embed_w"]                                              # (V_fm, D)
    aux_fm = params["fm_lin_w"][:, 0] - 0.5 * jnp.sum(emb * emb, axis=1)  # (V_fm,)
    bias_idx = v_fm + v_ll                                               # dedicated bias row
    w_t = jnp.zeros((_VOCAB_PAD, _VOCAB_PAD), jnp.float32)
    w_t = w_t.at[0:embed_dim, 0:v_fm].set(emb.T)
    w_t = w_t.at[embed_dim, 0:v_fm].set(aux_fm)
    w_t = w_t.at[embed_dim, v_fm:v_fm + v_ll].set(params["ll_lin_w"][:, 0])
    w_t = w_t.at[embed_dim, bias_idx].set(params["fm_lin_b"][0] + params["ll_lin_b"][0])
    return w_t, bias_idx


# ------------------------------- forward -------------------------------------
@jax.jit
def fmw_forward(params, fm_x, linear_x):
    B, _ = fm_x.shape
    v_fm, D = params["embed_w"].shape
    v_ll = params["ll_lin_w"].shape[0]
    assert D + 1 <= _VOCAB_PAD and v_fm + v_ll + 2 <= _VOCAB_PAD

    w_t, bias_idx = _build_fused_table(params, D)         # tiny (128,128) build, fused into jit
    null_idx = v_fm + v_ll + 1                            # all-zero table row (padding)

    # Offset indices into the fused vocab; one extra slot per row selects the bias row.
    fm_idx = fm_x.astype(jnp.int32) + params["fm_offsets"][None, :]
    ll_idx = linear_x.astype(jnp.int32) + params["ll_offsets"][None, :] + v_fm
    bias_col = jnp.full((B, 1), bias_idx, jnp.int32)
    idx = jnp.concatenate([fm_idx, ll_idx, bias_col], axis=1)           # (B, F+F2+1)

    # Pad field slots to a multiple of 8 and the batch to a multiple of the tile; only
    # the 4 B/slot index array is padded (never an embedding slab).
    n_slots = idx.shape[1]
    fp = _round_up(n_slots, 8)
    if fp != n_slots:
        idx = jnp.pad(idx, ((0, 0), (0, fp - n_slots)), constant_values=null_idx)

    half = (B + 1) // 2
    tb = max(128, min(_TILE_B, _round_up(half, 128)))     # >=2 grid steps when B > 128 (v7x TCs)
    b_pad = _round_up(B, tb)
    if b_pad != B:
        idx = jnp.pad(idx, ((0, b_pad - B), (0, 0)), constant_values=null_idx)

    idx_t = idx.T                                         # (FP, b_pad): batch on lanes

    out = _fm_pallas(idx_t, w_t, embed_dim=D, tile_b=tb)  # (1, b_pad)
    return out[0, :B]                                     # squeeze(1) -> (B,)


def fmw_forward_ref(params, fm_x, linear_x):
    """Pure-JAX f32 reference with the exact PyTorch FMwModel semantics."""
    fm_idx = fm_x + params["fm_offsets"][None, :]
    ll_idx = linear_x + params["ll_offsets"][None, :]
    emb = jnp.take(params["embed_w"], fm_idx, axis=0)                   # (B, F, D)
    lin = jnp.sum(jnp.take(params["fm_lin_w"], fm_idx, axis=0), axis=1) + params["fm_lin_b"]
    ll = jnp.sum(jnp.take(params["ll_lin_w"], ll_idx, axis=0), axis=1) + params["ll_lin_b"]
    sq_of_sum = jnp.sum(emb, axis=1) ** 2
    sum_of_sq = jnp.sum(emb ** 2, axis=1)
    fm = 0.5 * jnp.sum(sq_of_sum - sum_of_sq, axis=1, keepdims=True)
    return jax.nn.sigmoid((lin + fm + ll)[:, 0])


# --------------------------------- main ---------------------------------------
if __name__ == "__main__":
    fm_field_dims = (5, 7, 3, 6)       # 4 FM fields, vocab 21
    linear_field_dims = (4, 8, 2)      # 3 linear-only fields, vocab 14
    embed_dim = 32
    batch = 4

    key = jax.random.PRNGKey(0)
    kp, kf, kl = jax.random.split(key, 3)
    params = init_params(kp, fm_field_dims, embed_dim, linear_field_dims)

    fm_x = jnp.stack(
        [jax.random.randint(jax.random.fold_in(kf, i), (batch,), 0, d, jnp.int32)
         for i, d in enumerate(fm_field_dims)], axis=1)                 # (B, 4)
    linear_x = jnp.stack(
        [jax.random.randint(jax.random.fold_in(kl, i), (batch,), 0, d, jnp.int32)
         for i, d in enumerate(linear_field_dims)], axis=1)             # (B, 3)

    out = jax.block_until_ready(fmw_forward(params, fm_x, linear_x))
    ref = fmw_forward_ref(params, fm_x, linear_x)

    assert out.shape == (batch,)
    # f32 table + exact 0/1 multi-hot rows: the only rounding source is the MXU's
    # f32-matmul precision, bounded well inside 1e-2 after the sigmoid at these scales.
    assert jnp.allclose(out, ref, atol=1e-2), (out, ref)
    print("KERNEL_OK")
</pallas_src>

<mosaic_0001>
module attributes {stable_mosaic.version = 11 : i64} {
  func.func @_fm_kernel(%arg0: i32, %arg1: memref<8x128xi32, #tpu.memory_space<vmem>>, %arg2: memref<128x128xf32, #tpu.memory_space<vmem>>, %arg3: memref<1x128xf32, #tpu.memory_space<vmem>>) attributes {dimension_semantics = [#tpu.dimension_semantics<parallel>], iteration_bounds = array<i64: 1>, scalar_prefetch = 0 : i64, scratch_operands = 0 : i64, tpu.core_type = #tpu.core_type<tc>, window_params = [{transform_indices = @transform_0, window_bounds = array<i64: 8, 128>}, {pipeline_mode = #tpu.pipeline_mode<synchronous>, transform_indices = @transform_1, window_bounds = array<i64: 128, 128>}, {transform_indices = @transform_2, window_bounds = array<i64: 1, 128>}]} {
    %c0 = arith.constant 0 : index
    %c0_0 = arith.constant 0 : index
    %0 = vector.load %arg1[%c0, %c0_0] : memref<8x128xi32, #tpu.memory_space<vmem>>, vector<8x128xi32>
    %1 = tpu.iota {dimensions = array<i32: 0>} : vector<128x128xi32>
    %cst = arith.constant 0.000000e+00 : f32
    %2 = vector.broadcast %cst : f32 to vector<128x128xf32>
    %3 = vector.extract_strided_slice %0 {offsets = [0, 0], sizes = [1, 128], strides = [1, 1]} : vector<8x128xi32> to vector<1x128xi32>
    %4 = vector.broadcast %3 : vector<1x128xi32> to vector<128x128xi32>
    %5 = arith.cmpi eq, %1, %4 : vector<128x128xi32>
    %6 = arith.extui %5 : vector<128x128xi1> to vector<128x128xi32>
    %7 = arith.sitofp %6 : vector<128x128xi32> to vector<128x128xf32>
    %8 = arith.addf %2, %7 : vector<128x128xf32>
    %9 = vector.extract_strided_slice %0 {offsets = [1, 0], sizes = [1, 128], strides = [1, 1]} : vector<8x128xi32> to vector<1x128xi32>
    %10 = vector.broadcast %9 : vector<1x128xi32> to vector<128x128xi32>
    %11 = arith.cmpi eq, %1, %10 : vector<128x128xi32>
    %12 = arith.extui %11 : vector<128x128xi1> to vector<128x128xi32>
    %13 = arith.sitofp %12 : vector<128x128xi32> to vector<128x128xf32>
    %14 = arith.addf %8, %13 : vector<128x128xf32>
    %15 = vector.extract_strided_slice %0 {offsets = [2, 0], sizes = [1, 128], strides = [1, 1]} : vector<8x128xi32> to vector<1x128xi32>
    %16 = vector.broadcast %15 : vector<1x128xi32> to vector<128x128xi32>
    %17 = arith.cmpi eq, %1, %16 : vector<128x128xi32>
    %18 = arith.extui %17 : vector<128x128xi1> to vector<128x128xi32>
    %19 = arith.sitofp %18 : vector<128x128xi32> to vector<128x128xf32>
    %20 = arith.addf %14, %19 : vector<128x128xf32>
    %21 = vector.extract_strided_slice %0 {offsets = [3, 0], sizes = [1, 128], strides = [1, 1]} : vector<8x128xi32> to vector<1x128xi32>
    %22 = vector.broadcast %21 : vector<1x128xi32> to vector<128x128xi32>
    %23 = arith.cmpi eq, %1, %22 : vector<128x128xi32>
    %24 = arith.extui %23 : vector<128x128xi1> to vector<128x128xi32>
    %25 = arith.sitofp %24 : vector<128x128xi32> to vector<128x128xf32>
    %26 = arith.addf %20, %25 : vector<128x128xf32>
    %27 = vector.extract_strided_slice %0 {offsets = [4, 0], sizes = [1, 128], strides = [1, 1]} : vector<8x128xi32> to vector<1x128xi32>
    %28 = vector.broadcast %27 : vector<1x128xi32> to vector<128x128xi32>
    %29 = arith.cmpi eq, %1, %28 : vector<128x128xi32>
    %30 = arith.extui %29 : vector<128x128xi1> to vector<128x128xi32>
    %31 = arith.sitofp %30 : vector<128x128xi32> to vector<128x128xf32>
    %32 = arith.addf %26, %31 : vector<128x128xf32>
    %33 = vector.extract_strided_slice %0 {offsets = [5, 0], sizes = [1, 128], strides = [1, 1]} : vector<8x128xi32> to vector<1x128xi32>
    %34 = vector.broadcast %33 : vector<1x128xi32> to vector<128x128xi32>
    %35 = arith.cmpi eq, %1, %34 : vector<128x128xi32>
    %36 = arith.extui %35 : vector<128x128xi1> to vector<128x128xi32>
    %37 = arith.sitofp %36 : vector<128x128xi32> to vector<128x128xf32>
    %38 = arith.addf %32, %37 : vector<128x128xf32>
    %39 = vector.extract_strided_slice %0 {offsets = [6, 0], sizes = [1, 128], strides = [1, 1]} : vector<8x128xi32> to vector<1x128xi32>
    %40 = vector.broadcast %39 : vector<1x128xi32> to vector<128x128xi32>
    %41 = arith.cmpi eq, %1, %40 : vector<128x128xi32>
    %42 = arith.extui %41 : vector<128x128xi1> to vector<128x128xi32>
    %43 = arith.sitofp %42 : vector<128x128xi32> to vector<128x128xf32>
    %44 = arith.addf %38, %43 : vector<128x128xf32>
    %45 = vector.extract_strided_slice %0 {offsets = [7, 0], sizes = [1, 128], strides = [1, 1]} : vector<8x128xi32> to vector<1x128xi32>
    %46 = vector.broadcast %45 : vector<1x128xi32> to vector<128x128xi32>
    %47 = arith.cmpi eq, %1, %46 : vector<128x128xi32>
    %48 = arith.extui %47 : vector<128x128xi1> to vector<128x128xi32>
    %49 = arith.sitofp %48 : vector<128x128xi32> to vector<128x128xf32>
    %50 = arith.addf %44, %49 : vector<128x128xf32>
    %c0_1 = arith.constant 0 : index
    %c0_2 = arith.constant 0 : index
    %51 = vector.load %arg2[%c0_1, %c0_2] : memref<128x128xf32, #tpu.memory_space<vmem>>, vector<128x128xf32>
    %cst_3 = arith.constant dense<0.000000e+00> : vector<128x128xf32>
    %52 = tpu.matmul %51, %50, %cst_3 {dimension_numbers = #tpu.dot_dimension_numbers<[1], [0], [0], [1], [0, 0, 1, 1], [], []>} : vector<128x128xf32>, vector<128x128xf32>, vector<128x128xf32> -> vector<128x128xf32>
    %53 = vector.extract_strided_slice %52 {offsets = [0, 0], sizes = [32, 128], strides = [1, 1]} : vector<128x128xf32> to vector<32x128xf32>
    %54 = vector.extract_strided_slice %52 {offsets = [32, 0], sizes = [1, 128], strides = [1, 1]} : vector<128x128xf32> to vector<1x128xf32>
    %55 = arith.mulf %53, %53 : vector<32x128xf32>
    %cst_4 = arith.constant dense<0.000000e+00> : vector<128xf32>
    %56 = vector.multi_reduction <add>, %55, %cst_4 [0] : vector<32x128xf32> to vector<128xf32>
    %57 = vector.shape_cast %56 : vector<128xf32> to vector<1x128xf32>
    %cst_5 = arith.constant 5.000000e-01 : f32
    %58 = vector.broadcast %cst_5 : f32 to vector<1x128xf32>
    %59 = arith.mulf %58, %57 : vector<1x128xf32>
    %60 = arith.addf %59, %54 : vector<1x128xf32>
    %61 = arith.negf %60 : vector<1x128xf32>
    %62 = math.exp %61 : vector<1x128xf32>
    %cst_6 = arith.constant 1.000000e+00 : f32
    %63 = vector.broadcast %cst_6 : f32 to vector<1x128xf32>
    %64 = arith.addf %63, %62 : vector<1x128xf32>
    %65 = arith.divf %63, %64 : vector<1x128xf32>
    %c0_7 = arith.constant 0 : index
    %c0_8 = arith.constant 0 : index
    %66 = vector.load %arg3[%c0_7, %c0_8] : memref<1x128xf32, #tpu.memory_space<vmem>>, vector<1x128xf32>
    tpu.vector_store %arg3[%c0_7, %c0_8], %65 {strides = array<i32>} : memref<1x128xf32, #tpu.memory_space<vmem>>, vector<1x128xf32>,
    return
  }
  func.func @transform_0(%arg0: i32) -> (i32, i32) {
    %c0_i32 = arith.constant 0 : i32
    %c0_i32_0 = arith.constant 0 : i32
    return %c0_i32, %arg0 : i32, i32
  }
  func.func @transform_1(%arg0: i32) -> (i32, i32) {
    %c0_i32 = arith.constant 0 : i32
    %c0_i32_0 = arith.constant 0 : i32
    %c0_i32_1 = arith.constant 0 : i32
    return %c0_i32, %c0_i32_0 : i32, i32
  }
  func.func @transform_2(%arg0: i32) -> (i32, i32) {
    %c0_i32 = arith.constant 0 : i32
    %c0_i32_0 = arith.constant 0 : i32
    return %c0_i32, %arg0 : i32, i32
  }
}

</mosaic_0001>

<bundles_post_ra>
// kernel: fmw_forward.1
= control target key start
LH: loop header
LB: loop body
LE: loop exit
PB: predicated region body
PF: predicated region fallthrough
CT: control target
= control target key end

     0   :  { %v12_v0 = vlaneseq  ;;  %v840_v16 = vmov 0.0   ;;  %s1372_s0 = inlined_call_operand.vmem [shape: s32[8,128], index: 0, kind: input, shape index: {}]   ;;  %s1373_s1 = inlined_call_operand.vmem [shape: f32[128,128], index: 1, kind: input, shape index: {}]   ;;  %s1374_s2 = inlined_call_operand.vmem [shape: f32[1,128], index: 2, kind: output, shape index: {}]  }
   0x1   :  { %v11_v1 = vld [vmem:[%s1372_s0] sm:$0xff] }
   0x2   :  { %v859_v2 = vshrl.u32 %v12_v0, 7  ;;  %v861_v3 = vperm.slane %v11_v1, 0  ;;  %v863_v4 = vperm.slane %v11_v1, 1  ;;  %v865_v5 = vperm.slane %v11_v1, 2 }
   0x3   :  { %v867_v6 = vperm.slane %v11_v1, 3  ;;  %v869_v7 = vperm.slane %v11_v1, 4  ;;  %v872_v9 = vperm.slane %v11_v1, 5  ;;  %v874_v10 = vperm.slane %v11_v1, 6 }
   0x4   :  { %v28_v8 = vadd.s32 120, %v859_v2  ;;  %v876_v11 = vperm.slane %v11_v1, 7  ;;  %v27_v12 = vadd.s32 112, %v859_v2  ;;  %v880_v13 = vadd.s32 104, %v859_v2 }
   0x5   :  { %v883_v14 = vadd.s32 96, %v859_v2  ;;  %v886_v15 = vadd.s32 88, %v859_v2  ;;  %v896_v20 = vadd.s32 80, %v859_v2 }
   0x6   :  { %vm45_vm0 = vcmp.eq.s32.totalorder %v28_v8, %v861_v3  ;;  %vm110_vm1 = vcmp.eq.s32.totalorder %v28_v8, %v863_v4  ;;  %vm175_vm2 = vcmp.eq.s32.totalorder %v28_v8, %v865_v5  ;;  %vm240_vm3 = vcmp.eq.s32.totalorder %v28_v8, %v867_v6 }
   0x7   :  { %v673_v17 = vsel %vm45_vm0, 1.0, %v840_v16  ;;  %v689_v18 = vsel %vm110_vm1, 1.0, %v840_v16  ;;  %v705_v19 = vsel %vm175_vm2, 1.0, %v840_v16  ;;  %vm305_vm4 = vcmp.eq.s32.totalorder %v28_v8, %v869_v7 }
   0x8   :  { %v158_v21 = vadd.f32 %v689_v18, %v673_v17  ;;  %vm370_vm5 = vcmp.eq.s32.totalorder %v28_v8, %v872_v9  ;;  %vm435_vm6 = vcmp.eq.s32.totalorder %v28_v8, %v874_v10  ;;  %v721_v22 = vsel %vm240_vm3, 1.0, %v840_v16 }
   0x9   :  { %v737_v23 = vsel %vm305_vm4, 1.0, %v840_v16  ;;  %v753_v24 = vsel %vm370_vm5, 1.0, %v840_v16  ;;  %vm500_vm7 = vcmp.eq.s32.totalorder %v28_v8, %v876_v11  ;;  %v769_v26 = vsel %vm435_vm6, 1.0, %v840_v16 }
   0xa   :  { %v223_v25 = vadd.f32 %v705_v19, %v158_v21  ;;  %vm44_vm8 = vcmp.eq.s32.totalorder %v27_v12, %v861_v3  ;;  %vm109_vm9 = vcmp.eq.s32.totalorder %v27_v12, %v863_v4  ;;  %vm174_vm10 = vcmp.eq.s32.totalorder %v27_v12, %v865_v5 }
   0xb   :  { %v672_v27 = vsel %vm44_vm8, 1.0, %v840_v16  ;;  %v688_v28 = vsel %vm109_vm9, 1.0, %v840_v16  ;;  %vm239_vm11 = vcmp.eq.s32.totalorder %v27_v12, %v867_v6  ;;  %v785_v30 = vsel %vm500_vm7, 1.0, %v840_v16 }
   0xc   :  { %v288_v29 = vadd.f32 %v721_v22, %v223_v25  ;;  %v157_v31 = vadd.f32 %v688_v28, %v672_v27  ;;  %v704_v32 = vsel %vm174_vm10, 1.0, %v840_v16  ;;  %v720_v33 = vsel %vm239_vm11, 1.0, %v840_v16 }
   0xd   :  { %vm304_vm12 = vcmp.eq.s32.totalorder %v27_v12, %v869_v7  ;;  %vm369_vm13 = vcmp.eq.s32.totalorder %v27_v12, %v872_v9  ;;  %vm434_vm14 = vcmp.eq.s32.totalorder %v27_v12, %v874_v10  ;;  %vm499_vm15 = vcmp.eq.s32.totalorder %v27_v12, %v876_v11 }
   0xe   :  { %v353_v34 = vadd.f32 %v737_v23, %v288_v29  ;;  %v222_v35 = vadd.f32 %v704_v32, %v157_v31  ;;  %v736_v36 = vsel %vm304_vm12, 1.0, %v840_v16  ;;  %v752_v37 = vsel %vm369_vm13, 1.0, %v840_v16 }
   0xf   :  { %v768_v38 = vsel %vm434_vm14, 1.0, %v840_v16  ;;  %vm43_vm0 = vcmp.eq.s32.totalorder %v880_v13, %v861_v3  ;;  %vm108_vm1 = vcmp.eq.s32.totalorder %v880_v13, %v863_v4  ;;  %vm173_vm2 = vcmp.eq.s32.totalorder %v880_v13, %v865_v5 }
  0x10   :  { %v418_v39 = vadd.f32 %v753_v24, %v353_v34  ;;  %v287_v40 = vadd.f32 %v720_v33, %v222_v35  ;;  %v671_v41 = vsel %vm43_vm0, 1.0, %v840_v16  ;;  %v687_v42 = vsel %vm108_vm1, 1.0, %v840_v16 }
  0x11   :  { %v156_v43 = vadd.f32 %v687_v42, %v671_v41  ;;  %vm238_vm3 = vcmp.eq.s32.totalorder %v880_v13, %v867_v6  ;;  %vm303_vm4 = vcmp.eq.s32.totalorder %v880_v13, %v869_v7  ;;  %v703_v46 = vsel %vm173_vm2, 1.0, %v840_v16 }
  0x12   :  { %v483_v44 = vadd.f32 %v769_v26, %v418_v39  ;;  %v352_v45 = vadd.f32 %v736_v36, %v287_v40  ;;  %v719_v47 = vsel %vm238_vm3, 1.0, %v840_v16  ;;  %v784_v48 = vsel %vm499_vm15, 1.0, %v840_v16 }
  0x13   :  { %v221_v49 = vadd.f32 %v703_v46, %v156_v43  ;;  %vm368_vm5 = vcmp.eq.s32.totalorder %v880_v13, %v872_v9  ;;  %vm433_vm6 = vcmp.eq.s32.totalorder %v880_v13, %v874_v10  ;;  %v735_v52 = vsel %vm303_vm4, 1.0, %v840_v16 }
  0x14   :  { %v548_v50 = vadd.f32 %v785_v30, %v483_v44  ;;  %v417_v51 = vadd.f32 %v752_v37, %v352_v45  ;;  %v751_v53 = vsel %vm368_vm5, 1.0, %v840_v16  ;;  %v767_v55 = vsel %vm433_vm6, 1.0, %v840_v16 }
  0x15   :  { %v286_v54 = vadd.f32 %v719_v47, %v221_v49  ;;  %vm42_vm7 = vcmp.eq.s32.totalorder %v883_v14, %v861_v3  ;;  %vm107_vm8 = vcmp.eq.s32.totalorder %v883_v14, %v863_v4  ;;  %vm498_vm9 = vcmp.eq.s32.totalorder %v880_v13, %v876_v11 }
  0x16   :  { %565 = vmatpush.msra.mxu0 %v548_v50  ;;  %v482_v56 = vadd.f32 %v768_v38, %v417_v51  ;;  %v670_v57 = vsel %vm42_vm7, 1.0, %v840_v16  ;;  %v686_v58 = vsel %vm107_vm8, 1.0, %v840_v16  ;;  %787 = vmatpush.msra.mxu1 %v548_v50  ;;  %vm172_vm10 = vcmp.eq.s32.totalorder %v883_v14, %v865_v5 }
  0x17   :  { %v351_v59 = vadd.f32 %v735_v52, %v286_v54  ;;  %v155_v60 = vadd.f32 %v686_v58, %v670_v57  ;;  %vm237_vm11 = vcmp.eq.s32.totalorder %v883_v14, %v867_v6  ;;  %788 = vmatpush.msra.mxu2 %v548_v50  ;;  %v702_v62 = vsel %vm172_vm10, 1.0, %v840_v16  ;;  %789 = vmatpush.msra.mxu3 %v548_v50 }
  0x18   :  { %v547_v61 = vadd.f32 %v784_v48, %v482_v56  ;;  %v718_v63 = vsel %vm237_vm11, 1.0, %v840_v16  ;;  %vm302_vm12 = vcmp.eq.s32.totalorder %v883_v14, %v869_v7  ;;  %vm367_vm13 = vcmp.eq.s32.totalorder %v883_v14, %v872_v9 }
  0x19   :  { %v416_v0 = vadd.f32 %v751_v53, %v351_v59  ;;  %v220_v1 = vadd.f32 %v702_v62, %v155_v60  ;;  %v965_v8 = vadd.s32 72, %v859_v2  ;;  %v783_v12 = vsel %vm498_vm9, 1.0, %v840_v16 }
  0x1a   :  { %566 = vmatpush.msra.mxu0 %v547_v61  ;;  %v734_v17 = vsel %vm302_vm12, 1.0, %v840_v16  ;;  %vm432_vm14 = vcmp.eq.s32.totalorder %v883_v14, %v874_v10  ;;  %vm41_vm15 = vcmp.eq.s32.totalorder %v886_v15, %v861_v3  ;;  %790 = vmatpush.msra.mxu1 %v547_v61  ;;  %v750_v21 = vsel %vm367_vm13, 1.0, %v840_v16 }
  0x1b   :  { %v481_v18 = vadd.f32 %v767_v55, %v416_v0  ;;  %v285_v19 = vadd.f32 %v718_v63, %v220_v1  ;;  %vm497_vm0 = vcmp.eq.s32.totalorder %v883_v14, %v876_v11  ;;  %791 = vmatpush.msra.mxu2 %v547_v61  ;;  %792 = vmatpush.msra.mxu3 %v547_v61  ;;  %v669_v13 = vsel %vm41_vm15, 1.0, %v840_v16 }
  0x1c   :  { %vm106_vm1 = vcmp.eq.s32.totalorder %v886_v15, %v863_v4  ;;  %vm171_vm2 = vcmp.eq.s32.totalorder %v886_v15, %v865_v5  ;;  %vm236_vm3 = vcmp.eq.s32.totalorder %v886_v15, %v867_v6  ;;  %v766_v26 = vsel %vm432_vm14, 1.0, %v840_v16 }
  0x1d   :  { %v546_v22 = vadd.f32 %v783_v12, %v481_v18  ;;  %v350_v23 = vadd.f32 %v734_v17, %v285_v19  ;;  %v685_v24 = vsel %vm106_vm1, 1.0, %v840_v16  ;;  %v701_v25 = vsel %vm171_vm2, 1.0, %v840_v16 }
  0x1e   :  { %v154_v27 = vadd.f32 %v685_v24, %v669_v13  ;;  %vm301_vm4 = vcmp.eq.s32.totalorder %v886_v15, %v869_v7  ;;  %vm366_vm5 = vcmp.eq.s32.totalorder %v886_v15, %v872_v9  ;;  %v782_v29 = vsel %vm497_vm0, 1.0, %v840_v16 }
  0x1f   :  { %567 = vmatpush.msra.mxu0 %v546_v22  ;;  %v415_v28 = vadd.f32 %v750_v21, %v350_v23  ;;  %v717_v30 = vsel %vm236_vm3, 1.0, %v840_v16  ;;  %v733_v31 = vsel %vm301_vm4, 1.0, %v840_v16  ;;  %793 = vmatpush.msra.mxu1 %v546_v22  ;;  %v749_v33 = vsel %vm366_vm5, 1.0, %v840_v16 }
  0x20   :  { %v219_v32 = vadd.f32 %v701_v25, %v154_v27  ;;  %vm431_vm6 = vcmp.eq.s32.totalorder %v886_v15, %v874_v10  ;;  %vm40_vm7 = vcmp.eq.s32.totalorder %v896_v20, %v861_v3  ;;  %794 = vmatpush.msra.mxu2 %v546_v22  ;;  %795 = vmatpush.msra.mxu3 %v546_v22  ;;  %v21_v63 = vadd.s32 64, %v859_v2 }
  0x21   :  { %v480_v34 = vadd.f32 %v766_v26, %v415_v28  ;;  %vm496_vm8 = vcmp.eq.s32.totalorder %v886_v15, %v876_v11  ;;  %v668_v14 = vsel %vm40_vm7, 1.0, %v840_v16  ;;  %vm105_vm9 = vcmp.eq.s32.totalorder %v896_v20, %v863_v4 }
  0x22   :  { %v284_v35 = vadd.f32 %v717_v30, %v219_v32  ;;  %v684_v36 = vsel %vm105_vm9, 1.0, %v840_v16  ;;  %vm170_vm10 = vcmp.eq.s32.totalorder %v896_v20, %v865_v5  ;;  %vm235_vm11 = vcmp.eq.s32.totalorder %v896_v20, %v867_v6 }
  0x23   :  { %v545_v37 = vadd.f32 %v782_v29, %v480_v34  ;;  %v765_v38 = vsel %vm431_vm6, 1.0, %v840_v16  ;;  %v153_v39 = vadd.f32 %v684_v36, %v668_v14  ;;  %v700_v40 = vsel %vm170_vm10, 1.0, %v840_v16 }
  0x24   :  { %v349_v41 = vadd.f32 %v733_v31, %v284_v35  ;;  %v716_v42 = vsel %vm235_vm11, 1.0, %v840_v16  ;;  %vm300_vm12 = vcmp.eq.s32.totalorder %v896_v20, %v869_v7  ;;  %vm365_vm13 = vcmp.eq.s32.totalorder %v896_v20, %v872_v9 }
  0x25   :  { %568 = vmatpush.msra.mxu0 %v545_v37  ;;  %v781_v43 = vsel %vm496_vm8, 1.0, %v840_v16  ;;  %v218_v44 = vadd.f32 %v700_v40, %v153_v39  ;;  %v732_v45 = vsel %vm300_vm12, 1.0, %v840_v16  ;;  %vm430_vm14 = vcmp.eq.s32.totalorder %v896_v20, %v874_v10  ;;  %796 = vmatpush.msra.mxu1 %v545_v37 }
  0x26   :  { %v414_v46 = vadd.f32 %v749_v33, %v349_v41  ;;  %v748_v47 = vsel %vm365_vm13, 1.0, %v840_v16  ;;  %vm39_vm15 = vcmp.eq.s32.totalorder %v965_v8, %v861_v3  ;;  %vm104_vm0 = vcmp.eq.s32.totalorder %v965_v8, %v863_v4  ;;  %797 = vmatpush.msra.mxu2 %v545_v37  ;;  %798 = vmatpush.msra.mxu3 %v545_v37 }
  0x27   :  { %v283_v48 = vadd.f32 %v716_v42, %v218_v44  ;;  %vm495_vm1 = vcmp.eq.s32.totalorder %v896_v20, %v876_v11  ;;  %v667_v15 = vsel %vm39_vm15, 1.0, %v840_v16  ;;  %v683_v49 = vsel %vm104_vm0, 1.0, %v840_v16 }
  0x28   :  { %v479_v50 = vadd.f32 %v765_v38, %v414_v46  ;;  %v152_v51 = vadd.f32 %v683_v49, %v667_v15  ;;  %vm169_vm2 = vcmp.eq.s32.totalorder %v965_v8, %v865_v5  ;;  %vm234_vm3 = vcmp.eq.s32.totalorder %v965_v8, %v867_v6 }
  0x29   :  { %v348_v52 = vadd.f32 %v732_v45, %v283_v48  ;;  %v699_v53 = vsel %vm169_vm2, 1.0, %v840_v16  ;;  %v715_v54 = vsel %vm234_vm3, 1.0, %v840_v16  ;;  %vm299_vm4 = vcmp.eq.s32.totalorder %v965_v8, %v869_v7 }
  0x2a   :  { %v544_v55 = vadd.f32 %v781_v43, %v479_v50  ;;  %v764_v56 = vsel %vm430_vm14, 1.0, %v840_v16  ;;  %v217_v57 = vadd.f32 %v699_v53, %v152_v51  ;;  %vm364_vm5 = vcmp.eq.s32.totalorder %v965_v8, %v872_v9 }
  0x2b   :  { %v413_v58 = vadd.f32 %v748_v47, %v348_v52  ;;  %v731_v59 = vsel %vm299_vm4, 1.0, %v840_v16  ;;  %vm429_vm6 = vcmp.eq.s32.totalorder %v965_v8, %v874_v10  ;;  %vm494_vm7 = vcmp.eq.s32.totalorder %v965_v8, %v876_v11 }
  0x2c   :  { %569 = vmatpush.msra.mxu0 %v544_v55  ;;  %v780_v60 = vsel %vm495_vm1, 1.0, %v840_v16  ;;  %v282_v61 = vadd.f32 %v715_v54, %v217_v57  ;;  %v747_v62 = vsel %vm364_vm5, 1.0, %v840_v16  ;;  %799 = vmatpush.msra.mxu1 %v544_v55  ;;  %v763_v1 = vsel %vm429_vm6, 1.0, %v840_v16 }
  0x2d   :  { %v478_v0 = vadd.f32 %v764_v56, %v413_v58  ;;  %v779_v12 = vsel %vm494_vm7, 1.0, %v840_v16  ;;  %v1068_v17 = vadd.s32 56, %v859_v2  ;;  %800 = vmatpush.msra.mxu2 %v544_v55  ;;  %801 = vmatpush.msra.mxu3 %v544_v55  ;;  %vm38_vm8 = vcmp.eq.s32.totalorder %v21_v63, %v861_v3 }
  0x2e   :  { %v347_v8 = vadd.f32 %v731_v59, %v282_v61  ;;  %vm103_vm9 = vcmp.eq.s32.totalorder %v21_v63, %v863_v4  ;;  %vm168_vm10 = vcmp.eq.s32.totalorder %v21_v63, %v865_v5  ;;  %v666_v18 = vsel %vm38_vm8, 1.0, %v840_v16 }
  0x2f   :  { %v543_v20 = vadd.f32 %v780_v60, %v478_v0  ;;  %v682_v19 = vsel %vm103_vm9, 1.0, %v840_v16  ;;  %v698_v21 = vsel %vm168_vm10, 1.0, %v840_v16  ;;  %vm233_vm11 = vcmp.eq.s32.totalorder %v21_v63, %v867_v6 }
  0x30   :  { %v412_v13 = vadd.f32 %v747_v62, %v347_v8  ;;  %v151_v22 = vadd.f32 %v682_v19, %v666_v18  ;;  %vm298_vm12 = vcmp.eq.s32.totalorder %v21_v63, %v869_v7  ;;  %v714_v23 = vsel %vm233_vm11, 1.0, %v840_v16 }
  0x31   :  { %570 = vmatpush.msra.mxu0 %v543_v20  ;;  %vm363_vm13 = vcmp.eq.s32.totalorder %v21_v63, %v872_v9  ;;  %v1081_v24 = vadd.s32 48, %v859_v2  ;;  %v1084_v25 = vadd.s32 40, %v859_v2  ;;  %802 = vmatpush.msra.mxu1 %v543_v20  ;;  %v730_v28 = vsel %vm298_vm12, 1.0, %v840_v16 }
  0x32   :  { %v477_v26 = vadd.f32 %v763_v1, %v412_v13  ;;  %v216_v27 = vadd.f32 %v698_v21, %v151_v22  ;;  %vm428_vm14 = vcmp.eq.s32.totalorder %v21_v63, %v874_v10  ;;  %803 = vmatpush.msra.mxu2 %v543_v20  ;;  %804 = vmatpush.msra.mxu3 %v543_v20  ;;  %v746_v31 = vsel %vm363_vm13, 1.0, %v840_v16 }
  0x33   :  { %vm493_vm15 = vcmp.eq.s32.totalorder %v21_v63, %v876_v11  ;;  %vm37_vm0 = vcmp.eq.s32.totalorder %v1068_v17, %v861_v3  ;;  %vm102_vm1 = vcmp.eq.s32.totalorder %v1068_v17, %v863_v4  ;;  %vm167_vm2 = vcmp.eq.s32.totalorder %v1068_v17, %v865_v5 }
  0x34   :  { %v542_v29 = vadd.f32 %v779_v12, %v477_v26  ;;  %v281_v30 = vadd.f32 %v714_v23, %v216_v27  ;;  %v665_v32 = vsel %vm37_vm0, 1.0, %v840_v16  ;;  %v681_v33 = vsel %vm102_vm1, 1.0, %v840_v16 }
  0x35   :  { %v697_v34 = vsel %vm167_vm2, 1.0, %v840_v16  ;;  %vm232_vm3 = vcmp.eq.s32.totalorder %v1068_v17, %v867_v6  ;;  %vm297_vm4 = vcmp.eq.s32.totalorder %v1068_v17, %v869_v7  ;;  %v762_v35 = vsel %vm428_vm14, 1.0, %v840_v16 }
  0x36   :  { %571 = vmatpush.msra.mxu0 %v542_v29  ;;  %v346_v14 = vadd.f32 %v730_v28, %v281_v30  ;;  %v778_v36 = vsel %vm493_vm15, 1.0, %v840_v16  ;;  %v150_v37 = vadd.f32 %v681_v33, %v665_v32  ;;  %805 = vmatpush.msra.mxu1 %v542_v29  ;;  %v713_v38 = vsel %vm232_vm3, 1.0, %v840_v16 }
  0x37   :  { %v729_v39 = vsel %vm297_vm4, 1.0, %v840_v16  ;;  %vm362_vm5 = vcmp.eq.s32.totalorder %v1068_v17, %v872_v9  ;;  %vm36_vm6 = vcmp.eq.s32.totalorder %v1081_v24, %v861_v3  ;;  %806 = vmatpush.msra.mxu2 %v542_v29  ;;  %vm427_vm7 = vcmp.eq.s32.totalorder %v1068_v17, %v874_v10  ;;  %807 = vmatpush.msra.mxu3 %v542_v29 }
  0x38   :  { %v411_v40 = vadd.f32 %v746_v31, %v346_v14  ;;  %v215_v41 = vadd.f32 %v697_v34, %v150_v37  ;;  %vm492_vm8 = vcmp.eq.s32.totalorder %v1068_v17, %v876_v11  ;;  %v745_v42 = vsel %vm362_vm5, 1.0, %v840_v16 }
  0x39   :  { %v664_v43 = vsel %vm36_vm6, 1.0, %v840_v16  ;;  %vm101_vm9 = vcmp.eq.s32.totalorder %v1081_v24, %v863_v4  ;;  %vm166_vm10 = vcmp.eq.s32.totalorder %v1081_v24, %v865_v5  ;;  %vm231_vm11 = vcmp.eq.s32.totalorder %v1081_v24, %v867_v6 }
  0x3a   :  { %v476_v44 = vadd.f32 %v762_v35, %v411_v40  ;;  %v280_v45 = vadd.f32 %v713_v38, %v215_v41  ;;  %v680_v46 = vsel %vm101_vm9, 1.0, %v840_v16  ;;  %v696_v47 = vsel %vm166_vm10, 1.0, %v840_v16 }
  0x3b   :  { %v149_v48 = vadd.f32 %v680_v46, %v664_v43  ;;  %vm296_vm12 = vcmp.eq.s32.totalorder %v1081_v24, %v869_v7  ;;  %vm361_vm13 = vcmp.eq.s32.totalorder %v1081_v24, %v872_v9  ;;  %v761_v50 = vsel %vm427_vm7, 1.0, %v840_v16 }
  0x3c   :  { %v541_v15 = vadd.f32 %v778_v36, %v476_v44  ;;  %v345_v49 = vadd.f32 %v729_v39, %v280_v45  ;;  %v712_v51 = vsel %vm231_vm11, 1.0, %v840_v16  ;;  %v777_v52 = vsel %vm492_vm8, 1.0, %v840_v16 }
  0x3d   :  { %v214_v53 = vadd.f32 %v696_v47, %v149_v48  ;;  %v728_v54 = vsel %vm296_vm12, 1.0, %v840_v16  ;;  %vm426_vm14 = vcmp.eq.s32.totalorder %v1081_v24, %v874_v10  ;;  %v744_v56 = vsel %vm361_vm13, 1.0, %v840_v16 }
  0x3e   :  { %572 = vmatpush.msra.mxu0 %v541_v15  ;;  %v410_v55 = vadd.f32 %v745_v42, %v345_v49  ;;  %vm491_vm15 = vcmp.eq.s32.totalorder %v1081_v24, %v876_v11  ;;  %vm35_vm0 = vcmp.eq.s32.totalorder %v1084_v25, %v861_v3  ;;  %808 = vmatpush.msra.mxu1 %v541_v15  ;;  %v760_v63 = vsel %vm426_vm14, 1.0, %v840_v16 }
  0x3f   :  { %v279_v57 = vadd.f32 %v712_v51, %v214_v53  ;;  %v663_v58 = vsel %vm35_vm0, 1.0, %v840_v16  ;;  %vm100_vm1 = vcmp.eq.s32.totalorder %v1084_v25, %v863_v4  ;;  %vm165_vm2 = vcmp.eq.s32.totalorder %v1084_v25, %v865_v5  ;;  %809 = vmatpush.msra.mxu2 %v541_v15  ;;  %810 = vmatpush.msra.mxu3 %v541_v15 }
  0x40   :  { %v475_v59 = vadd.f32 %v761_v50, %v410_v55  ;;  %v679_v60 = vsel %vm100_vm1, 1.0, %v840_v16  ;;  %v695_v61 = vsel %vm165_vm2, 1.0, %v840_v16  ;;  %vm230_vm3 = vcmp.eq.s32.totalorder %v1084_v25, %v867_v6 }
  0x41   :  { %v344_v62 = vadd.f32 %v728_v54, %v279_v57  ;;  %v148_v0 = vadd.f32 %v679_v60, %v663_v58  ;;  %vm295_vm4 = vcmp.eq.s32.totalorder %v1084_v25, %v869_v7  ;;  %v711_v12 = vsel %vm230_vm3, 1.0, %v840_v16 }
  0x42   :  { %v540_v1 = vadd.f32 %v777_v52, %v475_v59  ;;  %vm360_vm5 = vcmp.eq.s32.totalorder %v1084_v25, %v872_v9  ;;  %vm425_vm6 = vcmp.eq.s32.totalorder %v1084_v25, %v874_v10  ;;  %v776_v8 = vsel %vm491_vm15, 1.0, %v840_v16 }
  0x43   :  { %v409_v17 = vadd.f32 %v744_v56, %v344_v62  ;;  %v213_v20 = vadd.f32 %v695_v61, %v148_v0  ;;  %v727_v18 = vsel %vm295_vm4, 1.0, %v840_v16  ;;  %v743_v19 = vsel %vm360_vm5, 1.0, %v840_v16 }
  0x44   :  { %573 = vmatpush.msra.mxu0 %v540_v1  ;;  %v759_v21 = vsel %vm425_vm6, 1.0, %v840_v16  ;;  %vm490_vm7 = vcmp.eq.s32.totalorder %v1084_v25, %v876_v11  ;;  %v17_v13 = vadd.s32 32, %v859_v2  ;;  %811 = vmatpush.msra.mxu1 %v540_v1  ;;  %v1181_v26 = vadd.s32 24, %v859_v2 }
  0x45   :  { %v474_v22 = vadd.f32 %v760_v63, %v409_v17  ;;  %v278_v23 = vadd.f32 %v711_v12, %v213_v20  ;;  %v1184_v24 = vadd.s32 16, %v859_v2  ;;  %812 = vmatpush.msra.mxu2 %v540_v1  ;;  %813 = vmatpush.msra.mxu3 %v540_v1  ;;  %v775_v31 = vsel %vm490_vm7, 1.0, %v840_v16 }
  0x46   :  { %vm34_vm8 = vcmp.eq.s32.totalorder %v17_v13, %v861_v3  ;;  %vm99_vm9 = vcmp.eq.s32.totalorder %v17_v13, %v863_v4  ;;  %vm164_vm10 = vcmp.eq.s32.totalorder %v17_v13, %v865_v5  ;;  %vm229_vm11 = vcmp.eq.s32.totalorder %v17_v13, %v867_v6 }
  0x47   :  { %v539_v27 = vadd.f32 %v776_v8, %v474_v22  ;;  %v343_v28 = vadd.f32 %v727_v18, %v278_v23  ;;  %v662_v29 = vsel %vm34_vm8, 1.0, %v840_v16  ;;  %v678_v30 = vsel %vm99_vm9, 1.0, %v840_v16 }
  0x48   :  { %v147_v32 = vadd.f32 %v678_v30, %v662_v29  ;;  %v694_v33 = vsel %vm164_vm10, 1.0, %v840_v16  ;;  %vm294_vm12 = vcmp.eq.s32.totalorder %v17_v13, %v869_v7  ;;  %v710_v14 = vsel %vm229_vm11, 1.0, %v840_v16 }
  0x49   :  { %574 = vmatpush.msra.mxu0 %v539_v27  ;;  %v408_v34 = vadd.f32 %v743_v19, %v343_v28  ;;  %vm359_vm13 = vcmp.eq.s32.totalorder %v17_v13, %v872_v9  ;;  %v1201_v35 = vadd.s32 8, %v859_v2  ;;  %814 = vmatpush.msra.mxu1 %v539_v27  ;;  %v726_v37 = vsel %vm294_vm12, 1.0, %v840_v16 }
  0x4a   :  { %v212_v36 = vadd.f32 %v694_v33, %v147_v32  ;;  %v742_v25 = vsel %vm359_vm13, 1.0, %v840_v16  ;;  %vm424_vm14 = vcmp.eq.s32.totalorder %v17_v13, %v874_v10  ;;  %815 = vmatpush.msra.mxu2 %v539_v27  ;;  %816 = vmatpush.msra.mxu3 %v539_v27  ;;  %vm489_vm15 = vcmp.eq.s32.totalorder %v17_v13, %v876_v11 }
  0x4b   :  { %v473_v38 = vadd.f32 %v759_v21, %v408_v34  ;;  %vm33_vm0 = vcmp.eq.s32.totalorder %v1181_v26, %v861_v3  ;;  %vm98_vm1 = vcmp.eq.s32.totalorder %v1181_v26, %v863_v4  ;;  %vm163_vm2 = vcmp.eq.s32.totalorder %v1181_v26, %v865_v5 }
  0x4c   :  { %v277_v39 = vadd.f32 %v710_v14, %v212_v36  ;;  %v661_v40 = vsel %vm33_vm0, 1.0, %v840_v16  ;;  %v677_v41 = vsel %vm98_vm1, 1.0, %v840_v16  ;;  %v693_v44 = vsel %vm163_vm2, 1.0, %v840_v16 }
  0x4d   :  { %v538_v42 = vadd.f32 %v775_v31, %v473_v38  ;;  %v146_v43 = vadd.f32 %v677_v41, %v661_v40  ;;  %vm228_vm3 = vcmp.eq.s32.totalorder %v1181_v26, %v867_v6  ;;  %vm293_vm4 = vcmp.eq.s32.totalorder %v1181_v26, %v869_v7 }
  0x4e   :  { %v342_v45 = vadd.f32 %v726_v37, %v277_v39  ;;  %v709_v46 = vsel %vm228_vm3, 1.0, %v840_v16  ;;  %vm358_vm5 = vcmp.eq.s32.totalorder %v1181_v26, %v872_v9  ;;  %v758_v47 = vsel %vm424_vm14, 1.0, %v840_v16 }
  0x4f   :  { %575 = vmatpush.msra.mxu0 %v538_v42  ;;  %v774_v48 = vsel %vm489_vm15, 1.0, %v840_v16  ;;  %v211_v15 = vadd.f32 %v693_v44, %v146_v43  ;;  %v725_v49 = vsel %vm293_vm4, 1.0, %v840_v16  ;;  %817 = vmatpush.msra.mxu1 %v538_v42  ;;  %v741_v51 = vsel %vm358_vm5, 1.0, %v840_v16 }
  0x50   :  { %v407_v50 = vadd.f32 %v742_v25, %v342_v45  ;;  %vm423_vm6 = vcmp.eq.s32.totalorder %v1181_v26, %v874_v10  ;;  %vm32_vm7 = vcmp.eq.s32.totalorder %v1184_v24, %v861_v3  ;;  %818 = vmatpush.msra.mxu2 %v538_v42  ;;  %819 = vmatpush.msra.mxu3 %v538_v42 }
  0x51   :  { %v276_v52 = vadd.f32 %v709_v46, %v211_v15  ;;  %vm488_vm8 = vcmp.eq.s32.totalorder %v1181_v26, %v876_v11  ;;  %v660_v53 = vsel %vm32_vm7, 1.0, %v840_v16  ;;  %vm97_vm9 = vcmp.eq.s32.totalorder %v1184_v24, %v863_v4  ;;  %v558_v15 = vld [vmem:[%s1373_s1 + $0x48] sm:$0xff] }
  0x52   :  { %v472_v54 = vadd.f32 %v758_v47, %v407_v50  ;;  %v676_v55 = vsel %vm97_vm9, 1.0, %v840_v16  ;;  %vm162_vm10 = vcmp.eq.s32.totalorder %v1184_v24, %v865_v5  ;;  %vm227_vm11 = vcmp.eq.s32.totalorder %v1184_v24, %v867_v6  ;;  %v553_v47 = vld [vmem:[%s1373_s1 + $0x20] sm:$0xff]  ;;  %v551_v50 = vld [vmem:[%s1373_s1 + $0x10] sm:$0xff] }
  0x53   :  { %v341_v56 = vadd.f32 %v725_v49, %v276_v52  ;;  %v757_v57 = vsel %vm423_vm6, 1.0, %v840_v16  ;;  %v145_v58 = vadd.f32 %v676_v55, %v660_v53  ;;  %v692_v59 = vsel %vm162_vm10, 1.0, %v840_v16  ;;  %v562_v49 = vld [vmem:[%s1373_s1 + $0x68] sm:$0xff]  ;;  %v559_v52 = vld [vmem:[%s1373_s1 + $0x50] sm:$0xff]  ;;  %v556_v55 = vld [vmem:[%s1373_s1 + $0x38] sm:$0xff] }
  0x54   :  { %v537_v60 = vadd.f32 %v774_v48, %v472_v54  ;;  %v708_v61 = vsel %vm227_vm11, 1.0, %v840_v16  ;;  %vm292_vm12 = vcmp.eq.s32.totalorder %v1184_v24, %v869_v7  ;;  %vm357_vm13 = vcmp.eq.s32.totalorder %v1184_v24, %v872_v9  ;;  %v554_v48 = vld [vmem:[%s1373_s1 + $0x28] sm:$0xff]  ;;  %v563_v53 = vld [vmem:[%s1373_s1 + $0x70] sm:$0xff]  ;;  %v552_v54 = vld [vmem:[%s1373_s1 + $0x18] sm:$0xff] }
  0x55   :  { %v406_v62 = vadd.f32 %v741_v51, %v341_v56  ;;  %v773_v63 = vsel %vm488_vm8, 1.0, %v840_v16  ;;  %v210_v0 = vadd.f32 %v692_v59, %v145_v58  ;;  %vm422_vm14 = vcmp.eq.s32.totalorder %v1184_v24, %v874_v10  ;;  %v555_v51 = vld [vmem:[%s1373_s1 + $0x30] sm:$0xff]  ;;  %v560_v56 = vld [vmem:[%s1373_s1 + $0x58] sm:$0xff] }
  0x56   :  { %576 = vmatpush.msra.mxu0 %v537_v60  ;;  %v724_v1 = vsel %vm292_vm12, 1.0, %v840_v16  ;;  %v740_v12 = vsel %vm357_vm13, 1.0, %v840_v16  ;;  %vm31_vm15 = vcmp.eq.s32.totalorder %v1201_v35, %v861_v3  ;;  %vm96_vm0 = vcmp.eq.s32.totalorder %v1201_v35, %v863_v4  ;;  %820 = vmatpush.msra.mxu1 %v537_v60 }
  0x57   :  { %v471_v17 = vadd.f32 %v757_v57, %v406_v62  ;;  %v275_v8 = vadd.f32 %v708_v61, %v210_v0  ;;  %vm487_vm1 = vcmp.eq.s32.totalorder %v1184_v24, %v876_v11  ;;  %v659_v20 = vsel %vm31_vm15, 1.0, %v840_v16  ;;  %821 = vmatpush.msra.mxu2 %v537_v60  ;;  %822 = vmatpush.msra.mxu3 %v537_v60  ;;  %v564_v57 = vld [vmem:[%s1373_s1 + $0x78] sm:$0xff] }
  0x58   :  { %v675_v18 = vsel %vm96_vm0, 1.0, %v840_v16  ;;  %vm161_vm2 = vcmp.eq.s32.totalorder %v1201_v35, %v865_v5  ;;  %vm226_vm3 = vcmp.eq.s32.totalorder %v1201_v35, %v867_v6  ;;  %vm291_vm4 = vcmp.eq.s32.totalorder %v1201_v35, %v869_v7 }
  0x59   :  { %v536_v19 = vadd.f32 %v773_v63, %v471_v17  ;;  %v340_v21 = vadd.f32 %v724_v1, %v275_v8  ;;  %v144_v13 = vadd.f32 %v675_v18, %v659_v20  ;;  %v691_v22 = vsel %vm161_vm2, 1.0, %v840_v16 }
  0x5a   :  { %v756_v23 = vsel %vm422_vm14, 1.0, %v840_v16  ;;  %v707_v26 = vsel %vm226_vm3, 1.0, %v840_v16  ;;  %vm356_vm5 = vcmp.eq.s32.totalorder %v1201_v35, %v872_v9  ;;  %v772_v28 = vsel %vm487_vm1, 1.0, %v840_v16 }
  0x5b   :  { %577 = vmatpush.msra.mxu0 %v536_v19  ;;  %v405_v27 = vadd.f32 %v740_v12, %v340_v21  ;;  %v209_v29 = vadd.f32 %v691_v22, %v144_v13  ;;  %v723_v30 = vsel %vm291_vm4, 1.0, %v840_v16  ;;  %823 = vmatpush.msra.mxu1 %v536_v19  ;;  %vm421_vm6 = vcmp.eq.s32.totalorder %v1201_v35, %v874_v10 }
  0x5c   :  { %vm30_vm7 = vcmp.eq.s32.totalorder %v859_v2, %v861_v3  ;;  %vm95_vm8 = vcmp.eq.s32.totalorder %v859_v2, %v863_v4  ;;  %vm160_vm9 = vcmp.eq.s32.totalorder %v859_v2, %v865_v5  ;;  %824 = vmatpush.msra.mxu2 %v536_v19  ;;  %v739_v32 = vsel %vm356_vm5, 1.0, %v840_v16  ;;  %825 = vmatpush.msra.mxu3 %v536_v19 }
  0x5d   :  { %v470_v31 = vadd.f32 %v756_v23, %v405_v27  ;;  %v274_v24 = vadd.f32 %v707_v26, %v209_v29  ;;  %v658_v33 = vsel %vm30_vm7, 1.0, %v840_v16  ;;  %vm486_vm10 = vcmp.eq.s32.totalorder %v1201_v35, %v876_v11 }
  0x5e   :  { %v674_v34 = vsel %vm95_vm8, 1.0, %v840_v16  ;;  %v690_v3 = vsel %vm160_vm9, 1.0, %v840_v16  ;;  %vm225_vm11 = vcmp.eq.s32.totalorder %v859_v2, %v867_v6  ;;  %vm290_vm12 = vcmp.eq.s32.totalorder %v859_v2, %v869_v7 }
  0x5f   :  { %v535_v4 = vadd.f32 %v772_v28, %v470_v31  ;;  %v339_v5 = vadd.f32 %v723_v30, %v274_v24  ;;  %v143_v14 = vadd.f32 %v674_v34, %v658_v33  ;;  %v755_v36 = vsel %vm421_vm6, 1.0, %v840_v16 }
  0x60   :  { %v706_v37 = vsel %vm225_vm11, 1.0, %v840_v16  ;;  %vm355_vm13 = vcmp.eq.s32.totalorder %v859_v2, %v872_v9  ;;  %v771_v6 = vsel %vm486_vm10, 1.0, %v840_v16  ;;  %v722_v39 = vsel %vm290_vm12, 1.0, %v840_v16 }
  0x61   :  { %578 = vmatpush.msra.mxu0 %v535_v4  ;;  %v404_v25 = vadd.f32 %v739_v32, %v339_v5  ;;  %v208_v38 = vadd.f32 %v690_v3, %v143_v14  ;;  %826 = vmatpush.msra.mxu1 %v535_v4  ;;  %vm420_vm14 = vcmp.eq.s32.totalorder %v859_v2, %v874_v10  ;;  %v738_v35 = vsel %vm355_vm13, 1.0, %v840_v16  ;;  %v549_v10 = vld [vmem:[%s1373_s1] sm:$0xff] }
  0x62   :  { %827 = vmatpush.msra.mxu2 %v535_v4  ;;  %828 = vmatpush.msra.mxu3 %v535_v4  ;;  %vm485_vm15 = vcmp.eq.s32.totalorder %v859_v2, %v876_v11  ;;  %v754_v9 = vsel %vm420_vm14, 1.0, %v840_v16  ;;  %v557_v2 = vld [vmem:[%s1373_s1 + $0x40] sm:$0xff] }
  0x63   :  { %v469_v7 = vadd.f32 %v755_v36, %v404_v25  ;;  %v273_v40 = vadd.f32 %v706_v37, %v208_v38  ;;  %v770_v44 = vsel %vm485_vm15, 1.0, %v840_v16  ;;  %v561_v11 = vld [vmem:[%s1373_s1 + $0x60] sm:$0xff]  ;;  %v550_v16 = vld [vmem:[%s1373_s1 + $0x8] sm:$0xff] }
  0x65   :  { %v534_v41 = vadd.f32 %v771_v6, %v469_v7  ;;  %v338_v42 = vadd.f32 %v722_v39, %v273_v40 }
  0x67   :  { %579 = vmatpush.msra.mxu0 %v534_v41  ;;  %v403_v43 = vadd.f32 %v738_v35, %v338_v42  ;;  %829 = vmatpush.msra.mxu1 %v534_v41 }
  0x68   :  { %830 = vmatpush.msra.mxu2 %v534_v41  ;;  %831 = vmatpush.msra.mxu3 %v534_v41 }
  0x69   :  { %v468_v45 = vadd.f32 %v754_v9, %v403_v43 }
  0x6b   :  { %v533_v46 = vadd.f32 %v770_v44, %v468_v45 }
  0x6d   :  { %580 = vmatpush.msra.mxu0 %v533_v46  ;;  %832 = vmatpush.msra.mxu1 %v533_v46 }
  0x6e   :  { %581 = vmatmul.f32.vlgmr.msra.gmra.mxu0 %v549_v10  ;;  %833 = vmatpush.msra.mxu2 %v533_v46 }
  0x6f   :  { %834 = vmatpush.msra.mxu3 %v533_v46  ;;  %593 = vmatmul.f32.vlgmr.msra.gmra.mxu1 %v553_v47 }
  0x70   :  { %602 = vmatmul.f32.vlgmr.msra.gmra.mxu2 %v557_v2  ;;  %610 = vmatmul.f32.vlgmr.msra.gmra.mxu3 %v561_v11 }
  0x76   :  { %584 = vmatmul.f32.gmra.mxu0 %v550_v16 }
  0x77   :  { %596 = vmatmul.f32.gmra.mxu1 %v554_v48 }
  0x78   :  { %604 = vmatmul.f32.gmra.mxu2 %v558_v15  ;;  %612 = vmatmul.f32.gmra.mxu3 %v562_v49 }
  0x7e   :  { %587 = vmatmul.f32.gmra.mxu0 %v551_v50 }
  0x7f   :  { %598 = vmatmul.f32.gmra.mxu1 %v555_v51 }
  0x80   :  { %606 = vmatmul.f32.gmra.mxu2 %v559_v52  ;;  %614 = vmatmul.f32.gmra.mxu3 %v563_v53 }
  0x86   :  { %590 = vmatmul.f32.gmra.mxu0 %v552_v54 }
  0x87   :  { %600 = vmatmul.f32.gmra.mxu1 %v556_v55 }
  0x88   :  { %608 = vmatmul.f32.gmra.mxu2 %v560_v56  ;;  %616 = vmatmul.f32.gmra.mxu3 %v564_v57 }
  0xeb   :  { %v582_v58 = vpop.f32.mrf.mxu0 }
  0xec   :  { %v594_v59 = vpop.f32.mrf.mxu1  ;;  %v619_v20 = vmul.f32 %v582_v58, %v582_v58 }
  0xf3   :  { %v585_v60 = vpop.f32.mrf.mxu0  ;;  %v603_v61 = vpop.f32.mrf.mxu2 }
  0xf4   :  { %v611_v62 = vpop.f32.mrf.mxu3  ;;  %v597_v63 = vpop.f32.mrf.mxu1  ;;  %v620_v8 = vmul.f32 %v585_v60, %v585_v60 }
  0xf6   :  { %v623_v19 = vadd.f32 %v620_v8, %v619_v20 }
  0xfb   :  { %v588_v0 = vpop.f32.mrf.mxu0  ;;  %v605_v1 = vpop.f32.mrf.mxu2 }
  0xfc   :  { %v613_v12 = vpop.f32.mrf.mxu3  ;;  %v599_v17 = vpop.f32.mrf.mxu1  ;;  %v621_v18 = vmul.f32 %v588_v0, %v588_v0 }
  0xfe   :  { %v624_v22 = vadd.f32 %v623_v19, %v621_v18 }
 0x103   :  { %v591_v21 = vpop.f32.mrf.mxu0  ;;  %v607_v13 = vpop.f32.mrf.mxu2 }
 0x104   :  { %v622_v23 = vmul.f32 %v591_v21, %v591_v21  ;;  %v615_v26 = vpop.f32.mrf.mxu3  ;;  %v601_v27 = vpop.f32.mrf.mxu1 }
 0x106   :  { %v625_v28 = vadd.f32 %v624_v22, %v622_v23 }
 0x108   :  { %v626_v29 = vrot.slane %v625_v28, 4 }
 0x10a   :  { %v627_v30 = vadd.f32 %v626_v29, %v625_v28 }
 0x10b   :  { %v609_v31 = vpop.f32.mrf.mxu2 }
 0x10c   :  { %v628_v24 = vrot.slane %v627_v30, 2  ;;  %v617_v32 = vpop.f32.mrf.mxu3 }
 0x10e   :  { %v629_v33 = vadd.f32 %v628_v24, %v627_v30 }
 0x110   :  { %v630_v34 = vrot.slane %v629_v33, 1 }
 0x112   :  { %v631_v3 = vadd.f32 %v630_v34, %v629_v33 }
 0x114   :  { %v632_v4 = vmul.f32 0.5, %v631_v3 }
 0x116   :  { %v633_v5 = vadd.f32 %v632_v4, %v594_v59 }
 0x118   :  { %v786_v14 = vmul.f32 -1.442695, %v633_v5 }
 0x11a   :  { %836 = vpow2.f32 %v786_v14 }
 0x120   :  { %v837_v36 = vpop.eup %836 }
 0x121   :  { %v637_v37 = vadd.f32 1.0, %v837_v36 }
 0x123   :  { %838 = vrcp.f32 %v637_v37  ;;  %v649_v39 = vand.u32 2147483648, %v637_v37  ;;  %v647_v40 = vand.u32 2147483647, %v637_v37  ;;  %vm643_vm1 = vweird.f32 %v637_v37 }
 0x125   :  { %v650_v41 = vor.u32 1.1754944e-38, %v649_v39  ;;  %vm648_vm3 = vcmp.eq.f32.partialorder %v647_v40, 8.507059e+37 }
 0x129   :  { %v839_v25 = vpop.eup %838 }
 0x12a   :  { %v639_v38 = vmul.f32 %v839_v25, %v637_v37  ;;  %vm644_vm0 = vweird.f32 %v839_v25 }
 0x12b   :  { %vm645_vm2 = vmor %vm643_vm1, %vm644_vm0 }
 0x12c   :  { %v640_v6 = vsub.f32 1.0, %v639_v38 }
 0x12e   :  { %v641_v7 = vmul.f32 %v839_v25, %v640_v6 }
 0x130   :  { %v642_v35 = vadd.f32 %v839_v25, %v641_v7 }
 0x132   :  { %v646_v42 = vsel %vm645_vm2, %v839_v25, %v642_v35 }
 0x133   :  { %v651_v9 = vsel %vm648_vm3, %v650_v41, %v646_v42 }
 0x134   :  { %653 = vst [vmem:[%s1374_s2] sm:$0x1] %v651_v9 }

</bundles_post_ra>
